<compile_context>
chip_gen: v5e
topology: v5e:2x2
jax: 0.10.0
libtpu: 0.0.40
codegen_flags: <defaults>
</compile_context>

<pallas_src>
import jax
import jax.numpy as jnp
from jax.experimental import pallas as pl
from jax.experimental.pallas import tpu as pltpu

D_IN = 28 * 28  # 784


def autoencoder_kernel(x_ref,
                       w1_ref, w2_ref, w34_ref, w5_ref, w6_ref,
                       o_ref):
    """Full forward pass on one (TB, 784) batch tile.

    Matmuls run on the MXU with f32 accumulation; sigmoids run in f32 on the
    VPU/EUP via the tanh form (exact: sigmoid(x) = 0.5*tanh(0.5*x) + 0.5).
    Weights arrive already cast (bf16 by default) from the wrapper;
    activations are cast to the weight dtype only at MXU inputs.
    """
    cd = w1_ref.dtype  # compute dtype for MXU operands (bf16 or f32)

    def sigmoid(y):
        # One EUP transcendental + one VPU FMA; cheaper than exp + divide.
        return 0.5 * jnp.tanh(0.5 * y) + 0.5

    def layer(h, w_ref, activate=True):
        y = jnp.dot(h.astype(cd), w_ref[...], preferred_element_type=jnp.float32)
        return sigmoid(y) if activate else y

    h = layer(x_ref[...], w1_ref)    # (TB, 128)
    h = layer(h, w2_ref)             # (TB, 64)
    # Fused bottleneck: (h @ w3) @ w4 == h @ (w3 @ w4); no activation between.
    h = layer(h, w34_ref)            # (TB, 64)
    h = layer(h, w5_ref)             # (TB, 128)
    y = layer(h, w6_ref)             # (TB, 784)

    o_ref[...] = y.astype(o_ref.dtype)


def _round_up(x, m):
    return ((x + m - 1) // m) * m


def autoencoder_forward(x, weights, *, tb=1024, use_bf16=True,
                        vmem_limit_bytes=32 * 1024 * 1024):
    """x: (B, 784) f32.  weights: list of 6 arrays, each (in, out), f32.

    Notes:
      * tb=1024 is the sweet spot on all of v5e/v6e/v7x at the 32 MiB VMEM
        limit.  On v6e (128 MiB VMEM, single TC) tb=2048 with a larger
        vmem_limit_bytes is also fine; do NOT do that on v7x (64 MiB VMEM).
      * On v7x, callers with moderate B may prefer a tb giving grid >= 4 so
        the "parallel" batch axis keeps both TensorCores pipelined.
    """
    B, D = x.shape
    assert D == D_IN

    w1, w2, w3, w4, w5, w6 = weights
    # Exact algebraic fusion of the activation-free bottleneck (64x16 @ 16x64).
    w34 = jnp.dot(w3, w4, preferred_element_type=jnp.float32)
    ws = [w1, w2, w34, w5, w6]
    if use_bf16:
        ws = [w.astype(jnp.bfloat16) for w in ws]

    # Batch tile: as large as requested but never beyond B rounded to the
    # 8-sublane granule.  No wrapper-side padding: the grid uses cdiv and the
    # partial last block is masked by Pallas (rows are independent, so the
    # garbage rows computed in the padded tail are simply never stored).
    TB = min(tb, _round_up(B, 8))
    grid = (pl.cdiv(B, TB),)

    # Streaming specs for x / out; weights get a constant index_map so they
    # are fetched once and stay VMEM-resident across all grid steps.
    act_spec = pl.BlockSpec((TB, D), lambda i: (i, 0))
    w_specs = [pl.BlockSpec(w.shape, lambda i: (0, 0)) for w in ws]

    dtype_bytes = 4  # f32 HBM I/O for x and y
    w_bytes = sum(int(w.size) * w.dtype.itemsize for w in ws)
    cost = pl.CostEstimate(
        flops=2 * B * (784 * 128 + 128 * 64 + 64 * 64 + 64 * 128 + 128 * 784),
        transcendentals=B * (128 + 64 + 64 + 128 + 784),
        bytes_accessed=2 * B * D * dtype_bytes + w_bytes,
    )

    return pl.pallas_call(
        autoencoder_kernel,
        out_shape=jax.ShapeDtypeStruct((B, D), x.dtype),
        grid_spec=pltpu.PrefetchScalarGridSpec(
            num_scalar_prefetch=0,
            grid=grid,
            in_specs=[act_spec] + w_specs,
            out_specs=act_spec,
        ),
        compiler_params=pltpu.CompilerParams(
            dimension_semantics=("parallel",),
            vmem_limit_bytes=vmem_limit_bytes,
        ),
        cost_estimate=cost,
    )(x, *ws)


def init_weights(key):
    """Deterministic init matching PyTorch Linear shapes (stored transposed)."""
    dims = [(D_IN, 128), (128, 64), (64, 16),     # encoder
            (16, 64), (64, 128), (128, D_IN)]     # decoder
    weights = []
    for fan_in, fan_out in dims:
        key, sub = jax.random.split(key)
        bound = 1.0 / jnp.sqrt(jnp.float32(fan_in))
        # PyTorch nn.Linear weight is (out, in); we store (in, out) = W.T
        w = jax.random.uniform(sub, (fan_in, fan_out), jnp.float32,
                               minval=-bound, maxval=bound)
        weights.append(w)
    return weights


def reference_forward(x, weights):
    """Pure-JAX reference matching the PyTorch module exactly (f32)."""
    h = jax.nn.sigmoid(x @ weights[0])
    h = jax.nn.sigmoid(h @ weights[1])
    z = h @ weights[2]                       # bottleneck, no activation
    h = jax.nn.sigmoid(z @ weights[3])
    h = jax.nn.sigmoid(h @ weights[4])
    return jax.nn.sigmoid(h @ weights[5])


if __name__ == "__main__":
    key = jax.random.PRNGKey(0)
    kx, kx2, kw = jax.random.split(key, 3)
    weights = init_weights(kw)

    # --- Case 1: small batch, single grid step, block exactly fits. ---------
    B = 8
    x = jax.random.normal(kx, (B, D_IN), jnp.float32)
    y_ref = reference_forward(x, weights)

    # f32 path: only the (exact) bottleneck fusion / tanh-form sigmoid perturb
    # rounding at the ulp level.
    y_f32 = jax.block_until_ready(autoencoder_forward(x, weights, use_bf16=False))
    assert y_f32.shape == (B, D_IN)
    assert jnp.allclose(y_f32, y_ref, atol=1e-4, rtol=1e-4)

    # bf16-MXU path (default): same semantics within bf16 operand precision.
    y = jax.block_until_ready(autoencoder_forward(x, weights))
    assert y.shape == (B, D_IN)
    assert jnp.allclose(y, y_ref, atol=5e-2, rtol=0)

    # --- Case 2: B not a multiple of the tile, >1 grid step. ----------------
    # Exercises the masked partial last block and the multi-step pipeline
    # (no wrapper-side pad / slice anywhere).
    B2 = 20
    x2 = jax.random.normal(kx2, (B2, D_IN), jnp.float32)
    y2_ref = reference_forward(x2, weights)
    y2 = jax.block_until_ready(
        autoencoder_forward(x2, weights, tb=8, use_bf16=False))
    assert y2.shape == (B2, D_IN)
    assert jnp.allclose(y2, y2_ref, atol=1e-4, rtol=1e-4)

    print("KERNEL_OK")
</pallas_src>

<mosaic_0001>
module attributes {stable_mosaic.version = 11 : i64} {
  func.func @autoencoder_kernel(%arg0: i32, %arg1: memref<8x784xf32, #tpu.memory_space<vmem>>, %arg2: memref<784x128xf32, #tpu.memory_space<vmem>>, %arg3: memref<128x64xf32, #tpu.memory_space<vmem>>, %arg4: memref<64x64xf32, #tpu.memory_space<vmem>>, %arg5: memref<64x128xf32, #tpu.memory_space<vmem>>, %arg6: memref<128x784xf32, #tpu.memory_space<vmem>>, %arg7: memref<8x784xf32, #tpu.memory_space<vmem>>) attributes {dimension_semantics = [#tpu.dimension_semantics<parallel>], iteration_bounds = array<i64: 1>, scalar_prefetch = 0 : i64, scratch_operands = 0 : i64, tpu.core_type = #tpu.core_type<tc>, window_params = [{transform_indices = @transform_0, window_bounds = array<i64: 8, 784>}, {pipeline_mode = #tpu.pipeline_mode<synchronous>, transform_indices = @transform_1, window_bounds = array<i64: 784, 128>}, {pipeline_mode = #tpu.pipeline_mode<synchronous>, transform_indices = @transform_2, window_bounds = array<i64: 128, 64>}, {pipeline_mode = #tpu.pipeline_mode<synchronous>, transform_indices = @transform_3, window_bounds = array<i64: 64, 64>}, {pipeline_mode = #tpu.pipeline_mode<synchronous>, transform_indices = @transform_4, window_bounds = array<i64: 64, 128>}, {pipeline_mode = #tpu.pipeline_mode<synchronous>, transform_indices = @transform_5, window_bounds = array<i64: 128, 784>}, {transform_indices = @transform_6, window_bounds = array<i64: 8, 784>}]} {
    %c0 = arith.constant 0 : index
    %c0_0 = arith.constant 0 : index
    %0 = vector.load %arg1[%c0, %c0_0] : memref<8x784xf32, #tpu.memory_space<vmem>>, vector<8x784xf32>
    %c0_1 = arith.constant 0 : index
    %c0_2 = arith.constant 0 : index
    %1 = vector.load %arg2[%c0_1, %c0_2] : memref<784x128xf32, #tpu.memory_space<vmem>>, vector<784x128xf32>
    %cst = arith.constant dense<0.000000e+00> : vector<8x128xf32>
    %2 = tpu.matmul %0, %1, %cst {dimension_numbers = #tpu.dot_dimension_numbers<[1], [0], [0], [1], [0, 0, 1, 1], [], []>} : vector<8x784xf32>, vector<784x128xf32>, vector<8x128xf32> -> vector<8x128xf32>
    %cst_3 = arith.constant 5.000000e-01 : f32
    %3 = vector.broadcast %cst_3 : f32 to vector<8x128xf32>
    %4 = arith.mulf %3, %2 : vector<8x128xf32>
    %5 = math.tanh %4 : vector<8x128xf32>
    %cst_4 = arith.constant 5.000000e-01 : f32
    %6 = vector.broadcast %cst_4 : f32 to vector<8x128xf32>
    %7 = arith.mulf %6, %5 : vector<8x128xf32>
    %cst_5 = arith.constant 5.000000e-01 : f32
    %8 = vector.broadcast %cst_5 : f32 to vector<8x128xf32>
    %9 = arith.addf %7, %8 : vector<8x128xf32>
    %c0_6 = arith.constant 0 : index
    %c0_7 = arith.constant 0 : index
    %10 = vector.load %arg3[%c0_6, %c0_7] : memref<128x64xf32, #tpu.memory_space<vmem>>, vector<128x64xf32>
    %cst_8 = arith.constant dense<0.000000e+00> : vector<8x64xf32>
    %11 = tpu.matmul %9, %10, %cst_8 {dimension_numbers = #tpu.dot_dimension_numbers<[1], [0], [0], [1], [0, 0, 1, 1], [], []>} : vector<8x128xf32>, vector<128x64xf32>, vector<8x64xf32> -> vector<8x64xf32>
    %cst_9 = arith.constant 5.000000e-01 : f32
    %12 = vector.broadcast %cst_9 : f32 to vector<8x64xf32>
    %13 = arith.mulf %12, %11 : vector<8x64xf32>
    %14 = math.tanh %13 : vector<8x64xf32>
    %cst_10 = arith.constant 5.000000e-01 : f32
    %15 = vector.broadcast %cst_10 : f32 to vector<8x64xf32>
    %16 = arith.mulf %15, %14 : vector<8x64xf32>
    %cst_11 = arith.constant 5.000000e-01 : f32
    %17 = vector.broadcast %cst_11 : f32 to vector<8x64xf32>
    %18 = arith.addf %16, %17 : vector<8x64xf32>
    %c0_12 = arith.constant 0 : index
    %c0_13 = arith.constant 0 : index
    %19 = vector.load %arg4[%c0_12, %c0_13] : memref<64x64xf32, #tpu.memory_space<vmem>>, vector<64x64xf32>
    %cst_14 = arith.constant dense<0.000000e+00> : vector<8x64xf32>
    %20 = tpu.matmul %18, %19, %cst_14 {dimension_numbers = #tpu.dot_dimension_numbers<[1], [0], [0], [1], [0, 0, 1, 1], [], []>} : vector<8x64xf32>, vector<64x64xf32>, vector<8x64xf32> -> vector<8x64xf32>
    %cst_15 = arith.constant 5.000000e-01 : f32
    %21 = vector.broadcast %cst_15 : f32 to vector<8x64xf32>
    %22 = arith.mulf %21, %20 : vector<8x64xf32>
    %23 = math.tanh %22 : vector<8x64xf32>
    %cst_16 = arith.constant 5.000000e-01 : f32
    %24 = vector.broadcast %cst_16 : f32 to vector<8x64xf32>
    %25 = arith.mulf %24, %23 : vector<8x64xf32>
    %cst_17 = arith.constant 5.000000e-01 : f32
    %26 = vector.broadcast %cst_17 : f32 to vector<8x64xf32>
    %27 = arith.addf %25, %26 : vector<8x64xf32>
    %c0_18 = arith.constant 0 : index
    %c0_19 = arith.constant 0 : index
    %28 = vector.load %arg5[%c0_18, %c0_19] : memref<64x128xf32, #tpu.memory_space<vmem>>, vector<64x128xf32>
    %cst_20 = arith.constant dense<0.000000e+00> : vector<8x128xf32>
    %29 = tpu.matmul %27, %28, %cst_20 {dimension_numbers = #tpu.dot_dimension_numbers<[1], [0], [0], [1], [0, 0, 1, 1], [], []>} : vector<8x64xf32>, vector<64x128xf32>, vector<8x128xf32> -> vector<8x128xf32>
    %cst_21 = arith.constant 5.000000e-01 : f32
    %30 = vector.broadcast %cst_21 : f32 to vector<8x128xf32>
    %31 = arith.mulf %30, %29 : vector<8x128xf32>
    %32 = math.tanh %31 : vector<8x128xf32>
    %cst_22 = arith.constant 5.000000e-01 : f32
    %33 = vector.broadcast %cst_22 : f32 to vector<8x128xf32>
    %34 = arith.mulf %33, %32 : vector<8x128xf32>
    %cst_23 = arith.constant 5.000000e-01 : f32
    %35 = vector.broadcast %cst_23 : f32 to vector<8x128xf32>
    %36 = arith.addf %34, %35 : vector<8x128xf32>
    %c0_24 = arith.constant 0 : index
    %c0_25 = arith.constant 0 : index
    %37 = vector.load %arg6[%c0_24, %c0_25] : memref<128x784xf32, #tpu.memory_space<vmem>>, vector<128x784xf32>
    %cst_26 = arith.constant dense<0.000000e+00> : vector<8x784xf32>
    %38 = tpu.matmul %36, %37, %cst_26 {dimension_numbers = #tpu.dot_dimension_numbers<[1], [0], [0], [1], [0, 0, 1, 1], [], []>} : vector<8x128xf32>, vector<128x784xf32>, vector<8x784xf32> -> vector<8x784xf32>
    %cst_27 = arith.constant 5.000000e-01 : f32
    %39 = vector.broadcast %cst_27 : f32 to vector<8x784xf32>
    %40 = arith.mulf %39, %38 : vector<8x784xf32>
    %41 = math.tanh %40 : vector<8x784xf32>
    %cst_28 = arith.constant 5.000000e-01 : f32
    %42 = vector.broadcast %cst_28 : f32 to vector<8x784xf32>
    %43 = arith.mulf %42, %41 : vector<8x784xf32>
    %cst_29 = arith.constant 5.000000e-01 : f32
    %44 = vector.broadcast %cst_29 : f32 to vector<8x784xf32>
    %45 = arith.addf %43, %44 : vector<8x784xf32>
    %c0_30 = arith.constant 0 : index
    %c0_31 = arith.constant 0 : index
    %46 = vector.load %arg7[%c0_30, %c0_31] : memref<8x784xf32, #tpu.memory_space<vmem>>, vector<8x784xf32>
    tpu.vector_store %arg7[%c0_30, %c0_31], %45 {strides = array<i32>} : memref<8x784xf32, #tpu.memory_space<vmem>>, vector<8x784xf32>,
    return
  }
  func.func @transform_0(%arg0: i32) -> (i32, i32) {
    %c0_i32 = arith.constant 0 : i32
    %c0_i32_0 = arith.constant 0 : i32
    return %arg0, %c0_i32 : i32, i32
  }
  func.func @transform_1(%arg0: i32) -> (i32, i32) {
    %c0_i32 = arith.constant 0 : i32
    %c0_i32_0 = arith.constant 0 : i32
    %c0_i32_1 = arith.constant 0 : i32
    return %c0_i32, %c0_i32_0 : i32, i32
  }
  func.func @transform_2(%arg0: i32) -> (i32, i32) {
    %c0_i32 = arith.constant 0 : i32
    %c0_i32_0 = arith.constant 0 : i32
    %c0_i32_1 = arith.constant 0 : i32
    return %c0_i32, %c0_i32_0 : i32, i32
  }
  func.func @transform_3(%arg0: i32) -> (i32, i32) {
    %c0_i32 = arith.constant 0 : i32
    %c0_i32_0 = arith.constant 0 : i32
    %c0_i32_1 = arith.constant 0 : i32
    return %c0_i32, %c0_i32_0 : i32, i32
  }
  func.func @transform_4(%arg0: i32) -> (i32, i32) {
    %c0_i32 = arith.constant 0 : i32
    %c0_i32_0 = arith.constant 0 : i32
    %c0_i32_1 = arith.constant 0 : i32
    return %c0_i32, %c0_i32_0 : i32, i32
  }
  func.func @transform_5(%arg0: i32) -> (i32, i32) {
    %c0_i32 = arith.constant 0 : i32
    %c0_i32_0 = arith.constant 0 : i32
    %c0_i32_1 = arith.constant 0 : i32
    return %c0_i32, %c0_i32_0 : i32, i32
  }
  func.func @transform_6(%arg0: i32) -> (i32, i32) {
    %c0_i32 = arith.constant 0 : i32
    %c0_i32_0 = arith.constant 0 : i32
    return %arg0, %c0_i32 : i32, i32
  }
}

</mosaic_0001>

<bundles_post_ra>
// kernel: tpu_custom_call.1
= control target key start
LH: loop header
LB: loop body
LE: loop exit
PB: predicated region body
PF: predicated region fallthrough
CT: control target
= control target key end

     0   :  { %s1533_s0 = inlined_call_operand.vmem [shape: f32[8,784], index: 0, kind: input, shape index: {}]   ;;  %s1534_s1 = inlined_call_operand.vmem [shape: f32[784,128], index: 1, kind: input, shape index: {}]   ;;  %s1535_s2 = inlined_call_operand.vmem [shape: f32[128,64], index: 2, kind: input, shape index: {}]   ;;  %s1536_s3 = inlined_call_operand.vmem [shape: f32[64,64], index: 3, kind: input, shape index: {}]   ;;  %s1537_s4 = inlined_call_operand.vmem [shape: f32[64,128], index: 4, kind: input, shape index: {}]   ;;  %s1538_s5 = inlined_call_operand.vmem [shape: f32[128,784], index: 5, kind: input, shape index: {}]   ;;  %s1539_s6 = inlined_call_operand.hbm [shape: f32[8,784], index: 6, kind: output, shape index: {}]  }
   0x1   :  { %v46_v0 = vld [vmem:[%s1534_s1 + $0x78] sm:$0xff]  ;;  %v45_v1 = vld [vmem:[%s1534_s1 + $0x70] sm:$0xff]  ;;  %v44_v4 = vld [vmem:[%s1534_s1 + $0x68] sm:$0xff] }
   0x2   :  { %v62_v2 = vld [vmem:[%s1534_s1 + $0xf8] sm:$0xff]  ;;  %133 = vmatpush.msra.mxu0 %v46_v0  ;;  %v61_v3 = vld [vmem:[%s1534_s1 + $0xf0] sm:$0xff]  ;;  %v60_v5 = vld [vmem:[%s1534_s1 + $0xe8] sm:$0xff] }
   0x3   :  { %153 = vmatpush.msra.mxu1 %v62_v2  ;;  %v43_v6 = vld [vmem:[%s1534_s1 + $0x60] sm:$0xff]  ;;  %v42_v8 = vld [vmem:[%s1534_s1 + $0x58] sm:$0xff]  ;;  %v77_v11 = vld [vmem:[%s1534_s1 + $0x170] sm:$0xff] }
   0x4   :  { %134 = vmatpush.msra.mxu0 %v45_v1  ;;  %v59_v7 = vld [vmem:[%s1534_s1 + $0xe0] sm:$0xff]  ;;  %v58_v9 = vld [vmem:[%s1534_s1 + $0xd8] sm:$0xff]  ;;  %v41_v13 = vld [vmem:[%s1534_s1 + $0x50] sm:$0xff] }
   0x5   :  { %154 = vmatpush.msra.mxu1 %v61_v3  ;;  %v78_v10 = vld [vmem:[%s1534_s1 + $0x178] sm:$0xff]  ;;  %v57_v14 = vld [vmem:[%s1534_s1 + $0xd0] sm:$0xff]  ;;  %v76_v15 = vld [vmem:[%s1534_s1 + $0x168] sm:$0xff] }
   0x6   :  { %135 = vmatpush.msra.mxu0 %v44_v4  ;;  %v94_v12 = vld [vmem:[%s1534_s1 + $0x1f8] sm:$0xff]  ;;  %173 = vmatpush.msra.mxu2 %v78_v10  ;;  %v93_v16 = vld [vmem:[%s1534_s1 + $0x1f0] sm:$0xff]  ;;  %v40_v17 = vld [vmem:[%s1534_s1 + $0x48] sm:$0xff] }
   0x7   :  { %155 = vmatpush.msra.mxu1 %v60_v5  ;;  %193 = vmatpush.msra.mxu3 %v94_v12  ;;  %v56_v18 = vld [vmem:[%s1534_s1 + $0xc8] sm:$0xff]  ;;  %v75_v20 = vld [vmem:[%s1534_s1 + $0x160] sm:$0xff]  ;;  %v74_v24 = vld [vmem:[%s1534_s1 + $0x158] sm:$0xff] }
   0x8   :  { %136 = vmatpush.msra.mxu0 %v43_v6  ;;  %174 = vmatpush.msra.mxu2 %v77_v11  ;;  %v92_v19 = vld [vmem:[%s1534_s1 + $0x1e8] sm:$0xff]  ;;  %v91_v21 = vld [vmem:[%s1534_s1 + $0x1e0] sm:$0xff]  ;;  %v90_v25 = vld [vmem:[%s1534_s1 + $0x1d8] sm:$0xff] }
   0x9   :  { %156 = vmatpush.msra.mxu1 %v59_v7  ;;  %194 = vmatpush.msra.mxu3 %v93_v16  ;;  %v39_v22 = vld [vmem:[%s1534_s1 + $0x40] sm:$0xff]  ;;  %v38_v26 = vld [vmem:[%s1534_s1 + $0x38] sm:$0xff]  ;;  %v73_v28 = vld [vmem:[%s1534_s1 + $0x150] sm:$0xff] }
   0xa   :  { %137 = vmatpush.msra.mxu0 %v42_v8  ;;  %v55_v23 = vld [vmem:[%s1534_s1 + $0xc0] sm:$0xff]  ;;  %175 = vmatpush.msra.mxu2 %v76_v15  ;;  %v54_v27 = vld [vmem:[%s1534_s1 + $0xb8] sm:$0xff]  ;;  %v89_v29 = vld [vmem:[%s1534_s1 + $0x1d0] sm:$0xff] }
   0xb   :  { %157 = vmatpush.msra.mxu1 %v58_v9  ;;  %195 = vmatpush.msra.mxu3 %v92_v19  ;;  %v37_v30 = vld [vmem:[%s1534_s1 + $0x30] sm:$0xff]  ;;  %v72_v32 = vld [vmem:[%s1534_s1 + $0x148] sm:$0xff]  ;;  %v71_v36 = vld [vmem:[%s1534_s1 + $0x140] sm:$0xff] }
   0xc   :  { %138 = vmatpush.msra.mxu0 %v41_v13  ;;  %176 = vmatpush.msra.mxu2 %v75_v20  ;;  %v53_v31 = vld [vmem:[%s1534_s1 + $0xb0] sm:$0xff]  ;;  %v88_v33 = vld [vmem:[%s1534_s1 + $0x1c8] sm:$0xff]  ;;  %v87_v37 = vld [vmem:[%s1534_s1 + $0x1c0] sm:$0xff] }
   0xd   :  { %158 = vmatpush.msra.mxu1 %v57_v14  ;;  %196 = vmatpush.msra.mxu3 %v91_v21  ;;  %v36_v34 = vld [vmem:[%s1534_s1 + $0x28] sm:$0xff]  ;;  %v35_v38 = vld [vmem:[%s1534_s1 + $0x20] sm:$0xff]  ;;  %v70_v40 = vld [vmem:[%s1534_s1 + $0x138] sm:$0xff] }
   0xe   :  { %139 = vmatpush.msra.mxu0 %v40_v17  ;;  %177 = vmatpush.msra.mxu2 %v74_v24  ;;  %v52_v35 = vld [vmem:[%s1534_s1 + $0xa8] sm:$0xff]  ;;  %v51_v39 = vld [vmem:[%s1534_s1 + $0xa0] sm:$0xff]  ;;  %v86_v41 = vld [vmem:[%s1534_s1 + $0x1b8] sm:$0xff] }
   0xf   :  { %159 = vmatpush.msra.mxu1 %v56_v18  ;;  %197 = vmatpush.msra.mxu3 %v90_v25  ;;  %v34_v42 = vld [vmem:[%s1534_s1 + $0x18] sm:$0xff]  ;;  %v69_v44 = vld [vmem:[%s1534_s1 + $0x130] sm:$0xff]  ;;  %v68_v48 = vld [vmem:[%s1534_s1 + $0x128] sm:$0xff] }
  0x10   :  { %140 = vmatpush.msra.mxu0 %v39_v22  ;;  %178 = vmatpush.msra.mxu2 %v73_v28  ;;  %v50_v43 = vld [vmem:[%s1534_s1 + $0x98] sm:$0xff]  ;;  %v85_v45 = vld [vmem:[%s1534_s1 + $0x1b0] sm:$0xff]  ;;  %v84_v49 = vld [vmem:[%s1534_s1 + $0x1a8] sm:$0xff] }
  0x11   :  { %160 = vmatpush.msra.mxu1 %v55_v23  ;;  %198 = vmatpush.msra.mxu3 %v89_v29  ;;  %v33_v46 = vld [vmem:[%s1534_s1 + $0x10] sm:$0xff]  ;;  %v32_v50 = vld [vmem:[%s1534_s1 + $0x8] sm:$0xff]  ;;  %v67_v52 = vld [vmem:[%s1534_s1 + $0x120] sm:$0xff] }
  0x12   :  { %141 = vmatpush.msra.mxu0 %v38_v26  ;;  %179 = vmatpush.msra.mxu2 %v72_v32  ;;  %v49_v47 = vld [vmem:[%s1534_s1 + $0x90] sm:$0xff]  ;;  %v48_v51 = vld [vmem:[%s1534_s1 + $0x88] sm:$0xff]  ;;  %v83_v53 = vld [vmem:[%s1534_s1 + $0x1a0] sm:$0xff] }
  0x13   :  { %161 = vmatpush.msra.mxu1 %v54_v27  ;;  %199 = vmatpush.msra.mxu3 %v88_v33  ;;  %v31_v54 = vld [vmem:[%s1534_s1] sm:$0xff]  ;;  %v110_v56 = vld [vmem:[%s1534_s1 + $0x278] sm:$0xff]  ;;  %v109_v60 = vld [vmem:[%s1534_s1 + $0x270] sm:$0xff] }
  0x14   :  { %142 = vmatpush.msra.mxu0 %v37_v30  ;;  %180 = vmatpush.msra.mxu2 %v71_v36  ;;  %v47_v55 = vld [vmem:[%s1534_s1 + $0x80] sm:$0xff]  ;;  %v126_v57 = vld [vmem:[%s1534_s1 + $0x2f8] sm:$0xff]  ;;  %v125_v61 = vld [vmem:[%s1534_s1 + $0x2f0] sm:$0xff] }
  0x15   :  { %162 = vmatpush.msra.mxu1 %v53_v31  ;;  %200 = vmatpush.msra.mxu3 %v87_v37  ;;  %v66_v58 = vld [vmem:[%s1534_s1 + $0x118] sm:$0xff]  ;;  %v65_v62 = vld [vmem:[%s1534_s1 + $0x110] sm:$0xff]  ;;  %v108_v0 = vld [vmem:[%s1534_s1 + $0x268] sm:$0xff] }
  0x16   :  { %143 = vmatpush.msra.mxu0 %v36_v34  ;;  %181 = vmatpush.msra.mxu2 %v70_v40  ;;  %v82_v59 = vld [vmem:[%s1534_s1 + $0x198] sm:$0xff]  ;;  %v81_v63 = vld [vmem:[%s1534_s1 + $0x190] sm:$0xff]  ;;  %v124_v1 = vld [vmem:[%s1534_s1 + $0x2e8] sm:$0xff] }
  0x17   :  { %163 = vmatpush.msra.mxu1 %v52_v35  ;;  %201 = vmatpush.msra.mxu3 %v86_v41  ;;  %v64_v2 = vld [vmem:[%s1534_s1 + $0x108] sm:$0xff]  ;;  %v107_v4 = vld [vmem:[%s1534_s1 + $0x260] sm:$0xff] }
  0x18   :  { %144 = vmatpush.msra.mxu0 %v35_v38  ;;  %182 = vmatpush.msra.mxu2 %v69_v44  ;;  %v80_v3 = vld [vmem:[%s1534_s1 + $0x188] sm:$0xff]  ;;  %v123_v5 = vld [vmem:[%s1534_s1 + $0x2e0] sm:$0xff] }
  0x19   :  { %164 = vmatpush.msra.mxu1 %v51_v39  ;;  %202 = vmatpush.msra.mxu3 %v85_v45 }
  0x1a   :  { %145 = vmatpush.msra.mxu0 %v34_v42  ;;  %183 = vmatpush.msra.mxu2 %v68_v48 }
  0x1b   :  { %165 = vmatpush.msra.mxu1 %v50_v43  ;;  %203 = vmatpush.msra.mxu3 %v84_v49 }
  0x1c   :  { %146 = vmatpush.msra.mxu0 %v33_v46  ;;  %184 = vmatpush.msra.mxu2 %v67_v52 }
  0x1d   :  { %166 = vmatpush.msra.mxu1 %v49_v47  ;;  %204 = vmatpush.msra.mxu3 %v83_v53 }
  0x1e   :  { %147 = vmatpush.msra.mxu0 %v32_v50  ;;  %185 = vmatpush.msra.mxu2 %v66_v58 }
  0x1f   :  { %167 = vmatpush.msra.mxu1 %v48_v51  ;;  %205 = vmatpush.msra.mxu3 %v82_v59 }
  0x20   :  { %148 = vmatpush.msra.mxu0 %v31_v54  ;;  %186 = vmatpush.msra.mxu2 %v65_v62 }
  0x21   :  { %168 = vmatpush.msra.mxu1 %v47_v55  ;;  %206 = vmatpush.msra.mxu3 %v81_v63 }
  0x22   :  { %213 = vmatpush.msrb.mxu0 %v110_v56 }
  0x23   :  { %233 = vmatpush.msrb.mxu1 %v126_v57 }
  0x24   :  { %214 = vmatpush.msrb.mxu0 %v109_v60 }
  0x25   :  { %234 = vmatpush.msrb.mxu1 %v125_v61 }
  0x26   :  { %11 = vsyncpa [#allocation3], 0  ;;  %215 = vmatpush.msrb.mxu0 %v108_v0  ;;  %v63_v6 = vld [vmem:[%s1534_s1 + $0x100] sm:$0xff]  ;;  %v106_v8 = vld [vmem:[%s1534_s1 + $0x258] sm:$0xff]  ;;  %187 = vmatpush.msra.mxu2 %v64_v2  ;;  %vm129_vm0 = vcmask 130048   ;;  %vm325_vm1 = vcmask 523264  }
  0x27   :  { %235 = vmatpush.msrb.mxu1 %v124_v1  ;;  %v79_v7 = vld [vmem:[%s1534_s1 + $0x180] sm:$0xff]  ;;  %v122_v9 = vld [vmem:[%s1534_s1 + $0x2d8] sm:$0xff]  ;;  %207 = vmatpush.msra.mxu3 %v80_v3  ;;  %v26_v10 = vld [vmem:[%s1533_s0 + $0x10] sm:$0xff]  ;;  %s682_s20 = sshll.u32 %s1539_s6, 4  ;;  %s683_s20 = int_to_ptr.hbm [resolvable:$true] %s682_s20 }
  0x28   :  { %216 = vmatpush.msrb.mxu0 %v107_v4  ;;  %v27_v11 = vld [vmem:[%s1533_s0 + $0x18] sm:$0xff]  ;;  %v105_v12 = vld [vmem:[%s1534_s1 + $0x250] sm:$0xff]  ;;  %188 = vmatpush.msra.mxu2 %v63_v6  ;;  %v128_v14 = vld [vmem:[%s1534_s1 + $0x308] sm:$0xff] }
  0x29   :  { %236 = vmatpush.msrb.mxu1 %v123_v5  ;;  %v121_v13 = vld [vmem:[%s1534_s1 + $0x2d0] sm:$0xff]  ;;  %208 = vmatpush.msra.mxu3 %v79_v7  ;;  %v24_v15 = vld [vmem:[%s1533_s0] sm:$0xff]  ;;  %v104_v16 = vld [vmem:[%s1534_s1 + $0x248] sm:$0xff] }
  0x2a   :  { %217 = vmatpush.msrb.mxu0 %v106_v8  ;;  %v120_v17 = vld [vmem:[%s1534_s1 + $0x2c8] sm:$0xff]  ;;  %189 = vmatmul.f32.vlgmr.msra.gmra.mxu2 %v26_v10  ;;  %v127_v19 = vld [vmem:[%s1534_s1 + $0x300] sm:$0xff]  ;;  %v292_v22 = vld [vmem:[%s1535_s2 + $0x78] sm:$0xff] }
  0x2b   :  { %237 = vmatpush.msrb.mxu1 %v122_v9  ;;  %209 = vmatmul.f32.vlgmr.msra.gmra.mxu3 %v27_v11  ;;  %v25_v18 = vld [vmem:[%s1533_s0 + $0x8] sm:$0xff]  ;;  %v103_v20 = vld [vmem:[%s1534_s1 + $0x240] sm:$0xff]  ;;  %v102_v23 = vld [vmem:[%s1534_s1 + $0x238] sm:$0xff] }
  0x2c   :  { %218 = vmatpush.msrb.mxu0 %v105_v12  ;;  %v119_v21 = vld [vmem:[%s1534_s1 + $0x2c0] sm:$0xff]  ;;  %267 = vmatpush.msrb.mxu2 %v128_v14  ;;  %v118_v24 = vld [vmem:[%s1534_s1 + $0x2b8] sm:$0xff]  ;;  %v30_v25 = vld [vmem:[%s1533_s0 + $0x30] sm:$0xff] }
  0x2d   :  { %238 = vmatpush.msrb.mxu1 %v121_v13  ;;  %149 = vmatmul.f32.vlgmr.msra.gmra.mxu0 %v24_v15  ;;  %v291_v26 = vld [vmem:[%s1535_s2 + $0x70] sm:$0xff]  ;;  %v100_v29 = vld [vmem:[%s1534_s1 + $0x228] sm:$0xff]  ;;  %v99_v31 = vld [vmem:[%s1534_s1 + $0x220] sm:$0xff] }
  0x2e   :  { %219 = vmatpush.msrb.mxu0 %v104_v16  ;;  %169 = vmatmul.f32.vlgmr.msra.gmra.mxu1 %v25_v18  ;;  %v101_v27 = vld [vmem:[%s1534_s1 + $0x230] sm:$0xff]  ;;  %v116_v30 = vld [vmem:[%s1534_s1 + $0x2a8] sm:$0xff]  ;;  %v115_v32 = vld [vmem:[%s1534_s1 + $0x2a0] sm:$0xff] }
  0x2f   :  { %239 = vmatpush.msrb.mxu1 %v120_v17  ;;  %268 = vmatpush.msrb.mxu2 %v127_v19  ;;  %v117_v28 = vld [vmem:[%s1534_s1 + $0x2b0] sm:$0xff]  ;;  %v98_v33 = vld [vmem:[%s1534_s1 + $0x218] sm:$0xff]  ;;  %v96_v37 = vld [vmem:[%s1534_s1 + $0x208] sm:$0xff] }
  0x30   :  { %220 = vmatpush.msrb.mxu0 %v103_v20  ;;  %293 = vmatpush.msrb.mxu3 %v292_v22  ;;  %v114_v34 = vld [vmem:[%s1534_s1 + $0x298] sm:$0xff]  ;;  %v97_v35 = vld [vmem:[%s1534_s1 + $0x210] sm:$0xff]  ;;  %v112_v38 = vld [vmem:[%s1534_s1 + $0x288] sm:$0xff] }
  0x31   :  { %240 = vmatpush.msrb.mxu1 %v119_v21  ;;  %v113_v36 = vld [vmem:[%s1534_s1 + $0x290] sm:$0xff]  ;;  %v95_v39 = vld [vmem:[%s1534_s1 + $0x200] sm:$0xff]  ;;  %v29_v42 = vld [vmem:[%s1533_s0 + $0x28] sm:$0xff] }
  0x32   :  { %221 = vmatpush.msrb.mxu0 %v102_v23  ;;  %691 = vmatmul.msk.f32.vlgmr.msrb.gmra.mxu2 %vm129_vm0, %v30_v25  ;;  %v111_v40 = vld [vmem:[%s1534_s1 + $0x280] sm:$0xff]  ;;  %v290_v43 = vld [vmem:[%s1535_s2 + $0x68] sm:$0xff]  ;;  %v288_v45 = vld [vmem:[%s1535_s2 + $0x58] sm:$0xff] }
  0x33   :  { %241 = vmatpush.msrb.mxu1 %v118_v24  ;;  %294 = vmatpush.msrb.mxu3 %v291_v26  ;;  %v28_v41 = vld [vmem:[%s1533_s0 + $0x20] sm:$0xff]  ;;  %v287_v46 = vld [vmem:[%s1535_s2 + $0x50] sm:$0xff]  ;;  %v286_v47 = vld [vmem:[%s1535_s2 + $0x48] sm:$0xff] }
  0x34   :  { %222 = vmatpush.msrb.mxu0 %v101_v27  ;;  %v289_v44 = vld [vmem:[%s1535_s2 + $0x60] sm:$0xff]  ;;  %v284_v49 = vld [vmem:[%s1535_s2 + $0x38] sm:$0xff]  ;;  %v283_v50 = vld [vmem:[%s1535_s2 + $0x30] sm:$0xff] }
  0x35   :  { %242 = vmatpush.msrb.mxu1 %v117_v28  ;;  %295 = vmatpush.msrb.mxu3 %v290_v43  ;;  %v285_v48 = vld [vmem:[%s1535_s2 + $0x40] sm:$0xff]  ;;  %v282_v51 = vld [vmem:[%s1535_s2 + $0x28] sm:$0xff]  ;;  %v280_v53 = vld [vmem:[%s1535_s2 + $0x18] sm:$0xff] }
  0x36   :  { %223 = vmatpush.msrb.mxu0 %v100_v29  ;;  %v281_v52 = vld [vmem:[%s1535_s2 + $0x20] sm:$0xff]  ;;  %v279_v54 = vld [vmem:[%s1535_s2 + $0x10] sm:$0xff]  ;;  %v278_v55 = vld [vmem:[%s1535_s2 + $0x8] sm:$0xff] }
  0x37   :  { %243 = vmatpush.msrb.mxu1 %v116_v30  ;;  %296 = vmatpush.msrb.mxu3 %v289_v44  ;;  %v277_v56 = vld [vmem:[%s1535_s2] sm:$0xff]  ;;  %v324_v59 = vld [vmem:[%s1536_s3 + $0x38] sm:$0xff]  ;;  %v323_v11 = vld [vmem:[%s1536_s3 + $0x30] sm:$0xff] }
  0x38   :  { %224 = vmatpush.msrb.mxu0 %v99_v31  ;;  %337 = vmatpush.msra.mxu2 %v324_v59  ;;  %v322_v12 = vld [vmem:[%s1536_s3 + $0x28] sm:$0xff]  ;;  %v321_v13 = vld [vmem:[%s1536_s3 + $0x20] sm:$0xff]  ;;  %v320_v14 = vld [vmem:[%s1536_s3 + $0x18] sm:$0xff] }
  0x39   :  { %244 = vmatpush.msrb.mxu1 %v115_v32  ;;  %297 = vmatpush.msrb.mxu3 %v288_v45  ;;  %v319_v15 = vld [vmem:[%s1536_s3 + $0x10] sm:$0xff]  ;;  %v318_v16 = vld [vmem:[%s1536_s3 + $0x8] sm:$0xff]  ;;  %v317_v17 = vld [vmem:[%s1536_s3] sm:$0xff] }
  0x3a   :  { %225 = vmatpush.msrb.mxu0 %v98_v33  ;;  %338 = vmatpush.msra.mxu2 %v323_v11  ;;  %v360_v18 = vld [vmem:[%s1537_s4 + $0x38] sm:$0xff]  ;;  %v359_v24 = vld [vmem:[%s1537_s4 + $0x30] sm:$0xff]  ;;  %v358_v25 = vld [vmem:[%s1537_s4 + $0x28] sm:$0xff] }
  0x3b   :  { %245 = vmatpush.msrb.mxu1 %v114_v34  ;;  %298 = vmatpush.msrb.mxu3 %v287_v46  ;;  %v357_v26 = vld [vmem:[%s1537_s4 + $0x20] sm:$0xff]  ;;  %v356_v27 = vld [vmem:[%s1537_s4 + $0x18] sm:$0xff]  ;;  %v355_v28 = vld [vmem:[%s1537_s4 + $0x10] sm:$0xff] }
  0x3c   :  { %226 = vmatpush.msrb.mxu0 %v97_v35  ;;  %339 = vmatpush.msra.mxu2 %v322_v12  ;;  %v354_v29 = vld [vmem:[%s1537_s4 + $0x8] sm:$0xff]  ;;  %v353_v30 = vld [vmem:[%s1537_s4] sm:$0xff]  ;;  %v494_v32 = vld [vmem:[%s1538_s5 + $0x350] sm:$0xff] }
  0x3d   :  { %246 = vmatpush.msrb.mxu1 %v113_v36  ;;  %299 = vmatpush.msrb.mxu3 %v286_v47  ;;  %v493_v31 = vld [vmem:[%s1538_s5 + $0x348] sm:$0xff]  ;;  %v495_v33 = vld [vmem:[%s1538_s5 + $0x358] sm:$0xff]  ;;  %v486_v34 = vld [vmem:[%s1538_s5 + $0x310] sm:$0xff] }
  0x3e   :  { %227 = vmatpush.msrb.mxu0 %v96_v37  ;;  %340 = vmatpush.msra.mxu2 %v321_v13  ;;  %v487_v35 = vld [vmem:[%s1538_s5 + $0x318] sm:$0xff]  ;;  %v488_v36 = vld [vmem:[%s1538_s5 + $0x320] sm:$0xff]  ;;  %v465_v43 = vld [vmem:[%s1538_s5 + $0x268] sm:$0xff] }
  0x3f   :  { %247 = vmatpush.msrb.mxu1 %v112_v38  ;;  %300 = vmatpush.msrb.mxu3 %v285_v48  ;;  %v479_v37 = vld [vmem:[%s1538_s5 + $0x2d8] sm:$0xff]  ;;  %v480_v38 = vld [vmem:[%s1538_s5 + $0x2e0] sm:$0xff]  ;;  %v466_v44 = vld [vmem:[%s1538_s5 + $0x270] sm:$0xff] }
  0x40   :  { %228 = vmatpush.msrb.mxu0 %v95_v39  ;;  %341 = vmatpush.msra.mxu2 %v320_v14  ;;  %v481_v39 = vld [vmem:[%s1538_s5 + $0x2e8] sm:$0xff]  ;;  %v467_v45 = vld [vmem:[%s1538_s5 + $0x278] sm:$0xff]  ;;  %v458_v46 = vld [vmem:[%s1538_s5 + $0x230] sm:$0xff] }
  0x41   :  { %248 = vmatpush.msrb.mxu1 %v111_v40  ;;  %229 = vmatmul.f32.vlgmr.msrb.gmra.mxu0 %v28_v41  ;;  %v472_v40 = vld [vmem:[%s1538_s5 + $0x2a0] sm:$0xff]  ;;  %v473_v41 = vld [vmem:[%s1538_s5 + $0x2a8] sm:$0xff]  ;;  %v459_v47 = vld [vmem:[%s1538_s5 + $0x238] sm:$0xff] }
  0x42   :  { %249 = vmatmul.f32.vlgmr.msrb.gmra.mxu1 %v29_v42  ;;  %301 = vmatpush.msrb.mxu3 %v284_v49  ;;  %v474_v42 = vld [vmem:[%s1538_s5 + $0x2b0] sm:$0xff]  ;;  %v460_v48 = vld [vmem:[%s1538_s5 + $0x240] sm:$0xff]  ;;  %v451_v49 = vld [vmem:[%s1538_s5 + $0x1f8] sm:$0xff] }
  0x43   :  { %342 = vmatpush.msra.mxu2 %v319_v15  ;;  %500 = vmatpush.msra.mxu0 %v493_v31  ;;  %v439_v59 = vld [vmem:[%s1538_s5 + $0x198] sm:$0xff]  ;;  %v409_v11 = vld [vmem:[%s1538_s5 + $0xa8] sm:$0xff]  ;;  %v410_v12 = vld [vmem:[%s1538_s5 + $0xb0] sm:$0xff] }
  0x44   :  { %302 = vmatpush.msrb.mxu3 %v283_v50  ;;  %520 = vmatpush.msra.mxu1 %v494_v32  ;;  %v452_v50 = vld [vmem:[%s1538_s5 + $0x200] sm:$0xff]  ;;  %v411_v13 = vld [vmem:[%s1538_s5 + $0xb8] sm:$0xff]  ;;  %v454_v14 = vld [vmem:[%s1538_s5 + $0x210] sm:$0xff] }
  0x45   :  { %343 = vmatpush.msra.mxu2 %v318_v16  ;;  %501 = vmatpush.msra.mxu0 %v486_v34  ;;  %v402_v15 = vld [vmem:[%s1538_s5 + $0x70] sm:$0xff]  ;;  %v403_v16 = vld [vmem:[%s1538_s5 + $0x78] sm:$0xff]  ;;  %v492_v34 = vld [vmem:[%s1538_s5 + $0x340] sm:$0xff] }
  0x46   :  { %303 = vmatpush.msrb.mxu3 %v282_v51  ;;  %521 = vmatpush.msra.mxu1 %v487_v35  ;;  %v453_v51 = vld [vmem:[%s1538_s5 + $0x208] sm:$0xff]  ;;  %v499_v31 = vld [vmem:[%s1538_s5 + $0x378] sm:$0xff]  ;;  %v490_v32 = vld [vmem:[%s1538_s5 + $0x330] sm:$0xff] }
  0x47   :  { %344 = vmatpush.msra.mxu2 %v317_v17  ;;  %502 = vmatpush.msra.mxu0 %v479_v37  ;;  %v404_v17 = vld [vmem:[%s1538_s5 + $0x80] sm:$0xff]  ;;  %v483_v35 = vld [vmem:[%s1538_s5 + $0x2f8] sm:$0xff]  ;;  %v485_v37 = vld [vmem:[%s1538_s5 + $0x308] sm:$0xff] }
  0x48   :  { %304 = vmatpush.msrb.mxu3 %v281_v52  ;;  %522 = vmatpush.msra.mxu1 %v480_v38  ;;  %v444_v52 = vld [vmem:[%s1538_s5 + $0x1c0] sm:$0xff] }
  0x49   :  { %372 = vmatpush.msrb.mxu2 %v360_v18  ;;  %503 = vmatpush.msra.mxu0 %v472_v40  ;;  %v447_v18 = vld [vmem:[%s1538_s5 + $0x1d8] sm:$0xff]  ;;  %v476_v38 = vld [vmem:[%s1538_s5 + $0x2c0] sm:$0xff]  ;;  %v478_v40 = vld [vmem:[%s1538_s5 + $0x2d0] sm:$0xff] }
  0x4a   :  { %305 = vmatpush.msrb.mxu3 %v280_v53  ;;  %523 = vmatpush.msra.mxu1 %v473_v41  ;;  %v445_v53 = vld [vmem:[%s1538_s5 + $0x1c8] sm:$0xff] }
  0x4b   :  { %373 = vmatpush.msrb.mxu2 %v359_v24  ;;  %504 = vmatpush.msra.mxu0 %v465_v43  ;;  %v469_v41 = vld [vmem:[%s1538_s5 + $0x288] sm:$0xff]  ;;  %v471_v43 = vld [vmem:[%s1538_s5 + $0x298] sm:$0xff] }
  0x4c   :  { %306 = vmatpush.msrb.mxu3 %v279_v54  ;;  %524 = vmatpush.msra.mxu1 %v466_v44  ;;  %v496_v54 = vld [vmem:[%s1538_s5 + $0x360] sm:$0xff]  ;;  %v433_v44 = vld [vmem:[%s1538_s5 + $0x168] sm:$0xff] }
  0x4d   :  { %374 = vmatpush.msrb.mxu2 %v358_v25  ;;  %505 = vmatpush.msra.mxu0 %v458_v46  ;;  %v388_v25 = vld [vmem:[%s1538_s5] sm:$0xff]  ;;  %v463_v46 = vld [vmem:[%s1538_s5 + $0x258] sm:$0xff] }
  0x4e   :  { %307 = vmatpush.msrb.mxu3 %v278_v55  ;;  %525 = vmatpush.msra.mxu1 %v459_v47  ;;  %v446_v55 = vld [vmem:[%s1538_s5 + $0x1d0] sm:$0xff]  ;;  %v464_v47 = vld [vmem:[%s1538_s5 + $0x260] sm:$0xff] }
  0x4f   :  { %375 = vmatpush.msrb.mxu2 %v357_v26  ;;  %506 = vmatpush.msra.mxu0 %v451_v49  ;;  %v389_v26 = vld [vmem:[%s1538_s5 + $0x8] sm:$0xff]  ;;  %v455_v49 = vld [vmem:[%s1538_s5 + $0x218] sm:$0xff] }
  0x50   :  { %308 = vmatpush.msrb.mxu3 %v277_v56  ;;  %526 = vmatpush.msra.mxu1 %v452_v50  ;;  %v489_v56 = vld [vmem:[%s1538_s5 + $0x328] sm:$0xff]  ;;  %v456_v50 = vld [vmem:[%s1538_s5 + $0x220] sm:$0xff] }
  0x51   :  { %376 = vmatpush.msrb.mxu2 %v356_v27  ;;  %507 = vmatpush.msra.mxu0 %v444_v52  ;;  %v390_v27 = vld [vmem:[%s1538_s5 + $0x10] sm:$0xff]  ;;  %v419_v52 = vld [vmem:[%s1538_s5 + $0xf8] sm:$0xff] }
  0x52   :  { %540 = vmatpush.msra.mxu3 %v495_v33  ;;  %527 = vmatpush.msra.mxu1 %v445_v53  ;;  %v491_v33 = vld [vmem:[%s1538_s5 + $0x338] sm:$0xff]  ;;  %v448_v53 = vld [vmem:[%s1538_s5 + $0x1e0] sm:$0xff] }
  0x53   :  { %377 = vmatpush.msrb.mxu2 %v355_v28 }
  0x54   :  { %541 = vmatpush.msra.mxu3 %v488_v36  ;;  %v484_v36 = vld [vmem:[%s1538_s5 + $0x300] sm:$0xff] }
  0x55   :  { %378 = vmatpush.msrb.mxu2 %v354_v29  ;;  %v497_v29 = vld [vmem:[%s1538_s5 + $0x368] sm:$0xff] }
  0x56   :  { %542 = vmatpush.msra.mxu3 %v481_v39  ;;  %v477_v39 = vld [vmem:[%s1538_s5 + $0x2c8] sm:$0xff] }
  0x57   :  { %379 = vmatpush.msrb.mxu2 %v353_v30  ;;  %v498_v30 = vld [vmem:[%s1538_s5 + $0x370] sm:$0xff] }
  0x58   :  { %543 = vmatpush.msra.mxu3 %v474_v42  ;;  %v470_v42 = vld [vmem:[%s1538_s5 + $0x290] sm:$0xff] }
  0x5a   :  { %544 = vmatpush.msra.mxu3 %v467_v45  ;;  %v462_v45 = vld [vmem:[%s1538_s5 + $0x250] sm:$0xff] }
  0x5c   :  { %545 = vmatpush.msra.mxu3 %v460_v48  ;;  %v426_v48 = vld [vmem:[%s1538_s5 + $0x130] sm:$0xff] }
  0x5e   :  { %546 = vmatpush.msra.mxu3 %v453_v51  ;;  %v457_v51 = vld [vmem:[%s1538_s5 + $0x228] sm:$0xff] }
  0x60   :  { %547 = vmatpush.msra.mxu3 %v446_v55  ;;  %v450_v55 = vld [vmem:[%s1538_s5 + $0x1f0] sm:$0xff] }
  0x62   :  { %548 = vmatpush.msra.mxu3 %v439_v59  ;;  %v443_v59 = vld [vmem:[%s1538_s5 + $0x1b8] sm:$0xff] }
  0xaa   :  { %v150_v57 = vpop.f32.mrf.mxu0 }
  0xab   :  { %v170_v58 = vpop.f32.mrf.mxu1 }
  0xac   :  { %v171_v60 = vadd.f32 %v170_v58, %v150_v57  ;;  %v437_v57 = vld [vmem:[%s1538_s5 + $0x188] sm:$0xff]  ;;  %v438_v58 = vld [vmem:[%s1538_s5 + $0x190] sm:$0xff] }
  0xad   :  { %v190_v61 = vpop.f32.mrf.mxu2  ;;  %508 = vmatpush.msra.mxu0 %v437_v57  ;;  %528 = vmatpush.msra.mxu1 %v438_v58  ;;  %v441_v57 = vld [vmem:[%s1538_s5 + $0x1a8] sm:$0xff]  ;;  %v442_v58 = vld [vmem:[%s1538_s5 + $0x1b0] sm:$0xff] }
  0xae   :  { %v191_v62 = vadd.f32 %v190_v61, %v171_v60  ;;  %v210_v63 = vpop.f32.mrf.mxu3  ;;  %v482_v60 = vld [vmem:[%s1538_s5 + $0x2f0] sm:$0xff] }
  0xaf   :  { %v430_v61 = vld [vmem:[%s1538_s5 + $0x150] sm:$0xff] }
  0xb0   :  { %v211_v0 = vadd.f32 %v210_v63, %v191_v62  ;;  %v431_v62 = vld [vmem:[%s1538_s5 + $0x158] sm:$0xff]  ;;  %v432_v63 = vld [vmem:[%s1538_s5 + $0x160] sm:$0xff]  ;;  %509 = vmatpush.msra.mxu0 %v430_v61  ;;  %v434_v61 = vld [vmem:[%s1538_s5 + $0x170] sm:$0xff] }
  0xb1   :  { %529 = vmatpush.msra.mxu1 %v431_v62  ;;  %549 = vmatpush.msra.mxu3 %v432_v63  ;;  %v435_v62 = vld [vmem:[%s1538_s5 + $0x178] sm:$0xff]  ;;  %v436_v63 = vld [vmem:[%s1538_s5 + $0x180] sm:$0xff] }
  0xb5   :  { %v270_v4 = vpop.f32.mrf.mxu2 }
  0xbe   :  { %v230_v1 = vpop.f32.mrf.mxu0 }
  0xbf   :  { %v250_v2 = vpop.f32.mrf.mxu1  ;;  %v231_v3 = vadd.f32 %v230_v1, %v211_v0  ;;  %v475_v0 = vld [vmem:[%s1538_s5 + $0x2b8] sm:$0xff] }
  0xc1   :  { %v251_v5 = vadd.f32 %v250_v2, %v231_v3  ;;  %v423_v2 = vld [vmem:[%s1538_s5 + $0x118] sm:$0xff]  ;;  %v424_v3 = vld [vmem:[%s1538_s5 + $0x120] sm:$0xff] }
  0xc2   :  { %510 = vmatpush.msra.mxu0 %v423_v2  ;;  %530 = vmatpush.msra.mxu1 %v424_v3  ;;  %v428_v2 = vld [vmem:[%s1538_s5 + $0x140] sm:$0xff]  ;;  %v429_v3 = vld [vmem:[%s1538_s5 + $0x148] sm:$0xff] }
  0xc3   :  { %v271_v6 = vadd.f32 %v270_v4, %v251_v5  ;;  %v425_v5 = vld [vmem:[%s1538_s5 + $0x128] sm:$0xff] }
  0xc4   :  { %550 = vmatpush.msra.mxu3 %v425_v5  ;;  %v420_v5 = vld [vmem:[%s1538_s5 + $0x100] sm:$0xff] }
  0xc5   :  { %v273_v7 = vmul.f32 0.5, %v271_v6  ;;  %v468_v6 = vld [vmem:[%s1538_s5 + $0x280] sm:$0xff] }
  0xc7   :  { %695 = vtanh.f32 %v273_v7  ;;  %v416_v7 = vld [vmem:[%s1538_s5 + $0xe0] sm:$0xff] }
  0xc8   :  { %511 = vmatpush.msra.mxu0 %v416_v7  ;;  %v422_v7 = vld [vmem:[%s1538_s5 + $0x110] sm:$0xff] }
  0xca   :  { %512 = vmatpush.msra.mxu0 %v409_v11  ;;  %v406_v11 = vld [vmem:[%s1538_s5 + $0x90] sm:$0xff] }
  0xcc   :  { %513 = vmatpush.msra.mxu0 %v402_v15  ;;  %v400_v15 = vld [vmem:[%s1538_s5 + $0x60] sm:$0xff] }
  0xcd   :  { %v696_v8 = vpop.eup %695 }
  0xce   :  { %v275_v9 = vmul.f32 0.5, %v696_v8  ;;  %v417_v8 = vld [vmem:[%s1538_s5 + $0xe8] sm:$0xff] }
  0xcf   :  { %531 = vmatpush.msra.mxu1 %v417_v8  ;;  %v413_v8 = vld [vmem:[%s1538_s5 + $0xc8] sm:$0xff] }
  0xd0   :  { %v276_v10 = vadd.f32 0.5, %v275_v9  ;;  %v418_v9 = vld [vmem:[%s1538_s5 + $0xf0] sm:$0xff] }
  0xd1   :  { %551 = vmatpush.msra.mxu3 %v418_v9  ;;  %532 = vmatpush.msra.mxu1 %v410_v12  ;;  %v414_v9 = vld [vmem:[%s1538_s5 + $0xd0] sm:$0xff]  ;;  %v407_v12 = vld [vmem:[%s1538_s5 + $0x98] sm:$0xff] }
  0xd2   :  { %309 = vmatmul.f32.vlgmr.msrb.gmra.mxu3 %v276_v10  ;;  %v461_v10 = vld [vmem:[%s1538_s5 + $0x248] sm:$0xff] }
  0xd3   :  { %552 = vmatpush.msra.mxu3 %v411_v13  ;;  %533 = vmatpush.msra.mxu1 %v403_v16  ;;  %v408_v13 = vld [vmem:[%s1538_s5 + $0xa0] sm:$0xff]  ;;  %v401_v16 = vld [vmem:[%s1538_s5 + $0x68] sm:$0xff] }
  0xd5   :  { %553 = vmatpush.msra.mxu3 %v404_v17  ;;  %v392_v17 = vld [vmem:[%s1538_s5 + $0x20] sm:$0xff] }
 0x155   :  { %v310_v19 = vpop.f32.mrf.mxu3 }
 0x156   :  { %v313_v20 = vmul.f32 0.5, %v310_v19  ;;  %v395_v19 = vld [vmem:[%s1538_s5 + $0x38] sm:$0xff] }
 0x157   :  { %514 = vmatpush.msra.mxu0 %v395_v19  ;;  %v394_v19 = vld [vmem:[%s1538_s5 + $0x30] sm:$0xff] }
 0x158   :  { %697 = vtanh.f32 %v313_v20  ;;  %v396_v20 = vld [vmem:[%s1538_s5 + $0x40] sm:$0xff] }
 0x159   :  { %534 = vmatpush.msra.mxu1 %v396_v20  ;;  %515 = vmatpush.msra.mxu0 %v388_v25 }
 0x15b   :  { %535 = vmatpush.msra.mxu1 %v389_v26  ;;  %580 = vmatpush.msrb.mxu0 %v497_v29 }
 0x15d   :  { %600 = vmatpush.msrb.mxu1 %v498_v30  ;;  %581 = vmatpush.msrb.mxu0 %v490_v32 }
 0x15e   :  { %v698_v21 = vpop.eup %697 }
 0x15f   :  { %v315_v22 = vmul.f32 0.5, %v698_v21  ;;  %601 = vmatpush.msrb.mxu1 %v491_v33  ;;  %582 = vmatpush.msrb.mxu0 %v483_v35 }
 0x161   :  { %v316_v23 = vadd.f32 0.5, %v315_v22  ;;  %v397_v22 = vld [vmem:[%s1538_s5 + $0x48] sm:$0xff]  ;;  %602 = vmatpush.msrb.mxu1 %v484_v36  ;;  %583 = vmatpush.msrb.mxu0 %v476_v38 }
 0x162   :  { %554 = vmatpush.msra.mxu3 %v397_v22 }
 0x163   :  { %692 = vmatmul.msk.f32.vlgmr.msra.gmra.mxu2 %vm325_vm1, %v316_v23  ;;  %v440_v23 = vld [vmem:[%s1538_s5 + $0x1a0] sm:$0xff]  ;;  %603 = vmatpush.msrb.mxu1 %v477_v39 }
 0x164   :  { %560 = vmatpush.msra.mxu2 %v496_v54  ;;  %555 = vmatpush.msra.mxu3 %v390_v27  ;;  %v449_v54 = vld [vmem:[%s1538_s5 + $0x1e8] sm:$0xff] }
 0x165   :  { %584 = vmatpush.msrb.mxu0 %v469_v41  ;;  %604 = vmatpush.msrb.mxu1 %v470_v42 }
 0x166   :  { %561 = vmatpush.msra.mxu2 %v489_v56  ;;  %620 = vmatpush.msrb.mxu3 %v499_v31  ;;  %v412_v56 = vld [vmem:[%s1538_s5 + $0xc0] sm:$0xff] }
 0x167   :  { %585 = vmatpush.msrb.mxu0 %v462_v45  ;;  %605 = vmatpush.msrb.mxu1 %v463_v46 }
 0x168   :  { %562 = vmatpush.msra.mxu2 %v482_v60  ;;  %621 = vmatpush.msrb.mxu3 %v492_v34  ;;  %v405_v60 = vld [vmem:[%s1538_s5 + $0x88] sm:$0xff] }
 0x169   :  { %586 = vmatpush.msrb.mxu0 %v455_v49  ;;  %606 = vmatpush.msrb.mxu1 %v456_v50 }
 0x16a   :  { %563 = vmatpush.msra.mxu2 %v475_v0  ;;  %622 = vmatpush.msrb.mxu3 %v485_v37  ;;  %v398_v0 = vld [vmem:[%s1538_s5 + $0x50] sm:$0xff] }
 0x16b   :  { %587 = vmatpush.msrb.mxu0 %v448_v53  ;;  %607 = vmatpush.msrb.mxu1 %v449_v54 }
 0x16c   :  { %564 = vmatpush.msra.mxu2 %v468_v6  ;;  %623 = vmatpush.msrb.mxu3 %v478_v40  ;;  %v421_v6 = vld [vmem:[%s1538_s5 + $0x108] sm:$0xff] }
 0x16d   :  { %588 = vmatpush.msrb.mxu0 %v441_v57  ;;  %608 = vmatpush.msrb.mxu1 %v442_v58 }
 0x16e   :  { %565 = vmatpush.msra.mxu2 %v461_v10  ;;  %624 = vmatpush.msrb.mxu3 %v471_v43  ;;  %v415_v10 = vld [vmem:[%s1538_s5 + $0xd8] sm:$0xff] }
 0x16f   :  { %589 = vmatpush.msrb.mxu0 %v434_v61  ;;  %609 = vmatpush.msrb.mxu1 %v435_v62 }
 0x170   :  { %566 = vmatpush.msra.mxu2 %v454_v14  ;;  %625 = vmatpush.msrb.mxu3 %v464_v47  ;;  %v399_v14 = vld [vmem:[%s1538_s5 + $0x58] sm:$0xff] }
 0x171   :  { %610 = vmatpush.msrb.mxu1 %v428_v2 }
 0x172   :  { %567 = vmatpush.msra.mxu2 %v447_v18  ;;  %626 = vmatpush.msrb.mxu3 %v457_v51  ;;  %v393_v18 = vld [vmem:[%s1538_s5 + $0x28] sm:$0xff] }
 0x173   :  { %611 = vmatpush.msrb.mxu1 %v421_v6 }
 0x174   :  { %568 = vmatpush.msra.mxu2 %v440_v23  ;;  %627 = vmatpush.msrb.mxu3 %v450_v55 }
 0x175   :  { %612 = vmatpush.msrb.mxu1 %v414_v9 }
 0x176   :  { %569 = vmatpush.msra.mxu2 %v433_v44  ;;  %628 = vmatpush.msrb.mxu3 %v443_v59 }
 0x177   :  { %613 = vmatpush.msrb.mxu1 %v407_v12 }
 0x178   :  { %570 = vmatpush.msra.mxu2 %v426_v48  ;;  %629 = vmatpush.msrb.mxu3 %v436_v63 }
 0x179   :  { %614 = vmatpush.msrb.mxu1 %v400_v15 }
 0x17a   :  { %571 = vmatpush.msra.mxu2 %v419_v52  ;;  %630 = vmatpush.msrb.mxu3 %v429_v3 }
 0x17b   :  { %615 = vmatpush.msrb.mxu1 %v393_v18 }
 0x17c   :  { %572 = vmatpush.msra.mxu2 %v412_v56  ;;  %631 = vmatpush.msrb.mxu3 %v422_v7 }
 0x17e   :  { %573 = vmatpush.msra.mxu2 %v405_v60  ;;  %632 = vmatpush.msrb.mxu3 %v415_v10 }
 0x180   :  { %574 = vmatpush.msra.mxu2 %v398_v0  ;;  %633 = vmatpush.msrb.mxu3 %v408_v13 }
 0x182   :  { %634 = vmatpush.msrb.mxu3 %v401_v16 }
 0x184   :  { %635 = vmatpush.msrb.mxu3 %v394_v19 }
 0x1e6   :  { %v346_v1 = vpop.f32.mrf.mxu2 }
 0x1e7   :  { %v349_v4 = vmul.f32 0.5, %v346_v1  ;;  %v427_v1 = vld [vmem:[%s1538_s5 + $0x138] sm:$0xff] }
 0x1e8   :  { %590 = vmatpush.msrb.mxu0 %v427_v1 }
 0x1e9   :  { %699 = vtanh.f32 %v349_v4  ;;  %v391_v4 = vld [vmem:[%s1538_s5 + $0x18] sm:$0xff]  ;;  %s743_s5 = smov [#allocation2]  }
 0x1ea   :  { %575 = vmatpush.msra.mxu2 %v391_v4  ;;  %591 = vmatpush.msrb.mxu0 %v420_v5  ;;  %s680_s17 = sshll.u32 %s743_s5, 4  ;;  %s681_s17 = int_to_ptr.vmem [resolvable:$true] %s680_s17 }
 0x1ec   :  { %592 = vmatpush.msrb.mxu0 %v413_v8 }
 0x1ee   :  { %593 = vmatpush.msrb.mxu0 %v406_v11 }
 0x1ef   :  { %v700_v21 = vpop.eup %699 }
 0x1f0   :  { %v351_v24 = vmul.f32 0.5, %v700_v21  ;;  %594 = vmatpush.msrb.mxu0 %v399_v14 }
 0x1f2   :  { %v352_v28 = vadd.f32 0.5, %v351_v24  ;;  %595 = vmatpush.msrb.mxu0 %v392_v17 }
 0x1f4   :  { %693 = vmatmul.msk.f32.vlgmr.msrb.gmra.mxu2 %vm325_vm1, %v352_v28 }
 0x277   :  { %v381_v20 = vpop.f32.mrf.mxu2 }
 0x278   :  { %v384_v21 = vmul.f32 0.5, %v381_v20 }
 0x27a   :  { %701 = vtanh.f32 %v384_v21 }
 0x280   :  { %v702_v22 = vpop.eup %701 }
 0x281   :  { %v386_v23 = vmul.f32 0.5, %v702_v22 }
 0x283   :  { %v387_v24 = vadd.f32 0.5, %v386_v23 }
 0x285   :  { %516 = vmatmul.f32.vlgmr.msra.gmra.mxu0 %v387_v24  ;;  %536 = vmatmul.f32.vlgmr.msra.gmra.mxu1 %v387_v24 }
 0x286   :  { %556 = vmatmul.f32.vlgmr.msra.gmra.mxu3 %v387_v24  ;;  %576 = vmatmul.f32.vlgmr.msra.gmra.mxu2 %v387_v24 }
 0x28d   :  { %596 = vmatmul.f32.vlgmr.msrb.gmra.mxu0 %v387_v24  ;;  %616 = vmatmul.f32.vlgmr.msrb.gmra.mxu1 %v387_v24 }
 0x28e   :  { %636 = vmatmul.f32.vlgmr.msrb.gmra.mxu3 %v387_v24 }
 0x302   :  { %v517_v25 = vpop.f32.mrf.mxu0  ;;  %v537_v26 = vpop.f32.mrf.mxu1 }
 0x303   :  { %v640_v27 = vmul.f32 0.5, %v517_v25  ;;  %v641_v28 = vmul.f32 0.5, %v537_v26 }
 0x305   :  { %703 = vtanh.f32 %v640_v27 }
 0x306   :  { %705 = vtanh.f32 %v641_v28 }
 0x309   :  { %v557_v29 = vpop.f32.mrf.mxu3  ;;  %v577_v30 = vpop.f32.mrf.mxu2 }
 0x30a   :  { %v642_v31 = vmul.f32 0.5, %v557_v29  ;;  %v643_v32 = vmul.f32 0.5, %v577_v30  ;;  %v597_v33 = vpop.f32.mrf.mxu0  ;;  %v617_v34 = vpop.f32.mrf.mxu1 }
 0x30b   :  { %v704_v35 = vpop.eup %703  ;;  %v644_v36 = vmul.f32 0.5, %v597_v33  ;;  %v645_v37 = vmul.f32 0.5, %v617_v34 }
 0x30c   :  { %v706_v38 = vpop.eup %705  ;;  %v654_v39 = vmul.f32 0.5, %v704_v35  ;;  %707 = vtanh.f32 %v642_v31 }
 0x30d   :  { %v655_v40 = vmul.f32 0.5, %v706_v38  ;;  %709 = vtanh.f32 %v643_v32 }
 0x30e   :  { %v661_v41 = vadd.f32 0.5, %v654_v39  ;;  %711 = vtanh.f32 %v644_v36 }
 0x30f   :  { %v662_v42 = vadd.f32 0.5, %v655_v40  ;;  %713 = vtanh.f32 %v645_v37 }
 0x310   :  { %668 = vst [vmem:[#allocation2] sm:$0xff] %v661_v41 }
 0x311   :  { %669 = vst [vmem:[#allocation2 + $0x8] sm:$0xff] %v662_v42  ;;  %v637_v43 = vpop.f32.mrf.mxu3 }
 0x312   :  { %v708_v44 = vpop.eup %707  ;;  %v646_v45 = vmul.f32 0.5, %v637_v43 }
 0x313   :  { %v710_v46 = vpop.eup %709  ;;  %v656_v47 = vmul.f32 0.5, %v708_v44 }
 0x314   :  { %v712_v48 = vpop.eup %711  ;;  %v657_v49 = vmul.f32 0.5, %v710_v46  ;;  %715 = vtanh.f32 %v646_v45 }
 0x315   :  { %v714_v50 = vpop.eup %713  ;;  %v663_v51 = vadd.f32 0.5, %v656_v47  ;;  %v658_v52 = vmul.f32 0.5, %v712_v48 }
 0x316   :  { %v664_v53 = vadd.f32 0.5, %v657_v49  ;;  %v659_v54 = vmul.f32 0.5, %v714_v50 }
 0x317   :  { %670 = vst [vmem:[#allocation2 + $0x10] sm:$0xff] %v663_v51  ;;  %v665_v55 = vadd.f32 0.5, %v658_v52 }
 0x318   :  { %671 = vst [vmem:[#allocation2 + $0x18] sm:$0xff] %v664_v53  ;;  %v666_v56 = vadd.f32 0.5, %v659_v54 }
 0x319   :  { %672 = vst [vmem:[#allocation2 + $0x20] sm:$0xff] %v665_v55 }
 0x31a   :  { %v716_v57 = vpop.eup %715  ;;  %673 = vst [vmem:[#allocation2 + $0x28] sm:$0xff] %v666_v56 }
 0x31b   :  { %v660_v58 = vmul.f32 0.5, %v716_v57 }
 0x31d   :  { %v667_v59 = vadd.f32 0.5, %v660_v58 }
 0x31f   :  { %674 = vst.msk [vmem:[#allocation2 + $0x30] sm:$0xff] %vm129_vm0, %v667_v59 }
 0x320   :  { %685 = dma.vmem_to_hbm [thread:$0]  %s681_s17, 896, %s683_s20, [#allocation3]  }
 0x321   :  { %741 = dma.done.wait [#allocation3], 896  }
 0x322   :  { %742 = vsyncadd [#allocation3], 4294966400 }
 0x323   :  { %690 = vsyncpa [#allocation3], 1 }

</bundles_post_ra>
